<compile_context>
chip_gen: v7x
topology: tpu7x:2x2x1
jax: 0.10.0
libtpu: 0.0.40
codegen_flags: <defaults>
</compile_context>

<pallas_src>
import math

import jax
import jax.numpy as jnp
from jax.experimental import pallas as pl
from jax.experimental.pallas import tpu as pltpu

LEAKY_SLOPE = 0.25

# Conservative budget so the fused single-kernel path fits the default scoped-VMEM
# limit on every generation (16 MiB on v5e, 32 MiB on v6e/v7x).
_FUSED_VMEM_BUDGET = 12 * 1024 * 1024


# ---------------------------------------------------------------------------
# small helpers
# ---------------------------------------------------------------------------
def _round_up(x, m):
    return ((x + m - 1) // m) * m


def _pad2d(a, rows, cols):
    r, c = a.shape
    if r == rows and c == cols:
        return a
    return jnp.pad(a, ((0, rows - r), (0, cols - c)))


def _leaky_relu(y):
    return jnp.where(y > 0, y, LEAKY_SLOPE * y)


def _tiles(M, N, K):
    # tm=256 feeds the 256-wide MXU on v6e/v7x (on v5e it simply means two passes
    # through the 128-wide arrays — harmless).  tn/tk lane-aligned.  Double-buffered
    # footprint at (256,512)+(512,256)+(256,256) f32 is ~2.5 MiB: well under the
    # default scoped-VMEM limit on all generations, so no vmem_limit override needed.
    tm = min(256, _round_up(M, 8))
    tn = min(256, _round_up(N, 128))
    tk = min(512, _round_up(K, 128))
    return tm, tn, tk


# ---------------------------------------------------------------------------
# fully fused 4-layer kernel (small-graph fast path, grid = ())
# ---------------------------------------------------------------------------
def _fused_gcn_kernel(x_ref, adj_ref, w0_ref, b0_ref, w1_ref, b1_ref,
                      w2_ref, b2_ref, w3_ref, b3_ref, o_ref):
    """Whole GCN_E_g2g forward with everything resident in VMEM.

    w0_ref already holds the masked weight (adj_g2g * W0), precomputed in the wrapper.
    """
    # gc0: x @ (adj_g2g * W0) + b0, leaky_relu
    h = jnp.dot(x_ref[...], w0_ref[...], preferred_element_type=jnp.float32)
    h = _leaky_relu(h + b0_ref[...])

    adj = adj_ref[...]
    # gc1..gc3: adj @ (h @ Wi) + bi, leaky_relu — all intermediates stay on-chip.
    for w_ref, b_ref in ((w1_ref, b1_ref), (w2_ref, b2_ref), (w3_ref, b3_ref)):
        s = jnp.dot(h, w_ref[...], preferred_element_type=jnp.float32)
        h = jnp.dot(adj, s, preferred_element_type=jnp.float32)
        h = _leaky_relu(h + b_ref[...])

    o_ref[...] = h.astype(o_ref.dtype)


def _fused_fits(Mp, Dp, Hps, itemsize):
    H0p, H1p, H2p = Hps
    n_params = Dp * Dp + Dp * H0p + H0p * H1p + H1p * H2p + Dp + H0p + H1p + H2p
    n_io = Mp * Dp + Mp * Mp + Mp * H2p
    n_live = 3 * Mp * max(Dp, H0p, H1p, H2p)       # h / support / next-h working set
    return (n_params + n_io + n_live) * max(itemsize, 4) <= _FUSED_VMEM_BUDGET


def _fused_forward(x, adj, w0m, b0, layers):
    (w1, b1), (w2, b2), (w3, b3) = layers
    M, D = x.shape
    H0, H1, H2 = w1.shape[1], w2.shape[1], w3.shape[1]
    Mp = _round_up(M, 8)
    Dp, H0p, H1p, H2p = (_round_up(d, 128) for d in (D, H0, H1, H2))

    # Pad once (lane-dense feature dims); zero padding is exact for these matmuls:
    # padded adj rows/cols are zero, padded bias entries are zero, padded rows/cols
    # of the output are sliced off below.
    x_p = _pad2d(x, Mp, Dp)
    adj_p = _pad2d(adj, Mp, Mp)
    w0_p = _pad2d(w0m, Dp, Dp)
    b0_p = _pad2d(b0.reshape(1, -1), 1, Dp)
    w1_p = _pad2d(w1, Dp, H0p)
    b1_p = _pad2d(b1.reshape(1, -1), 1, H0p)
    w2_p = _pad2d(w2, H0p, H1p)
    b2_p = _pad2d(b2.reshape(1, -1), 1, H1p)
    w3_p = _pad2d(w3, H1p, H2p)
    b3_p = _pad2d(b3.reshape(1, -1), 1, H2p)

    out = pl.pallas_call(
        _fused_gcn_kernel,
        out_shape=jax.ShapeDtypeStruct((Mp, H2p), x.dtype),
    )(x_p, adj_p, w0_p, b0_p, w1_p, b1_p, w2_p, b2_p, w3_p, b3_p)
    return out[:M, :H2]


# ---------------------------------------------------------------------------
# tiled fallback kernels (large graphs): accumulate directly into the resident
# f32 output tile — no separate acc scratch.
# ---------------------------------------------------------------------------
def _mm_kernel(a_ref, b_ref, o_ref):
    """o = a @ b  (tiled, f32 accumulation into the resident output tile)."""
    k = pl.program_id(2)

    @pl.when(k == 0)
    def _():
        o_ref[...] = jnp.zeros_like(o_ref)

    o_ref[...] += jnp.dot(a_ref[...], b_ref[...],
                          preferred_element_type=jnp.float32)


def _mm_bias_lrelu_kernel(a_ref, b_ref, bias_ref, o_ref):
    """o = leaky_relu(a @ b + bias)  (tiled, fused epilogue on the last K step)."""
    k = pl.program_id(2)

    @pl.when(k == 0)
    def _():
        o_ref[...] = jnp.zeros_like(o_ref)

    o_ref[...] += jnp.dot(a_ref[...], b_ref[...],
                          preferred_element_type=jnp.float32)

    @pl.when(k == pl.num_programs(2) - 1)
    def _():
        o_ref[...] = _leaky_relu(o_ref[...] + bias_ref[...])


_DIM_SEM = pltpu.CompilerParams(
    dimension_semantics=("parallel", "parallel", "arbitrary"))


def pallas_matmul(a, b):
    """a @ b with a tiled MXU kernel (f32 output)."""
    M, K = a.shape
    K2, N = b.shape
    assert K == K2
    tm, tn, tk = _tiles(M, N, K)
    Mp, Np, Kp = _round_up(M, tm), _round_up(N, tn), _round_up(K, tk)
    a_p = _pad2d(a, Mp, Kp)
    b_p = _pad2d(b, Kp, Np)

    out = pl.pallas_call(
        _mm_kernel,
        out_shape=jax.ShapeDtypeStruct((Mp, Np), jnp.float32),
        grid_spec=pltpu.PrefetchScalarGridSpec(
            num_scalar_prefetch=0,
            grid=(Mp // tm, Np // tn, Kp // tk),
            in_specs=[
                pl.BlockSpec((tm, tk), lambda i, j, k: (i, k)),
                pl.BlockSpec((tk, tn), lambda i, j, k: (k, j)),
            ],
            out_specs=pl.BlockSpec((tm, tn), lambda i, j, k: (i, j)),
        ),
        compiler_params=_DIM_SEM,
    )(a_p, b_p)
    return out[:M, :N].astype(a.dtype)


def pallas_matmul_bias_lrelu(a, b, bias):
    """leaky_relu(a @ b + bias) with a tiled MXU kernel and fused epilogue."""
    M, K = a.shape
    K2, N = b.shape
    assert K == K2
    tm, tn, tk = _tiles(M, N, K)
    Mp, Np, Kp = _round_up(M, tm), _round_up(N, tn), _round_up(K, tk)
    a_p = _pad2d(a, Mp, Kp)
    b_p = _pad2d(b, Kp, Np)
    bias_p = _pad2d(bias.reshape(1, N), 1, Np)

    out = pl.pallas_call(
        _mm_bias_lrelu_kernel,
        out_shape=jax.ShapeDtypeStruct((Mp, Np), jnp.float32),
        grid_spec=pltpu.PrefetchScalarGridSpec(
            num_scalar_prefetch=0,
            grid=(Mp // tm, Np // tn, Kp // tk),
            in_specs=[
                pl.BlockSpec((tm, tk), lambda i, j, k: (i, k)),
                pl.BlockSpec((tk, tn), lambda i, j, k: (k, j)),
                pl.BlockSpec((1, tn), lambda i, j, k: (0, j)),  # resident across i, k
            ],
            out_specs=pl.BlockSpec((tm, tn), lambda i, j, k: (i, j)),
        ),
        compiler_params=_DIM_SEM,
    )(a_p, b_p, bias_p)
    return out[:M, :N].astype(a.dtype)


# ---------------------------------------------------------------------------
# GCN_E_g2g forward (eval mode: dropout = identity)
# ---------------------------------------------------------------------------
def gcn_e_g2g_forward(x, adj, adj_g2g, params):
    (w0, b0), (w1, b1), (w2, b2), (w3, b3) = params

    # Hoist the g2g mask out of the kernels: tiny (D,D) elementwise op, done once.
    w0m = adj_g2g * w0

    M, D = x.shape
    Mp = _round_up(M, 8)
    Hps = tuple(_round_up(d, 128) for d in (w1.shape[1], w2.shape[1], w3.shape[1]))
    Dp = _round_up(D, 128)

    if _fused_fits(Mp, Dp, Hps, jnp.dtype(x.dtype).itemsize):
        # Single pallas_call: whole forward resident in VMEM.
        return _fused_forward(x, adj, w0m, b0, ((w1, b1), (w2, b2), (w3, b3)))

    # Tiled fallback for graphs that do not fit VMEM.
    h = pallas_matmul_bias_lrelu(x, w0m, b0)
    for (w, b) in ((w1, b1), (w2, b2), (w3, b3)):
        support = pallas_matmul(h, w)                  # h @ W
        h = pallas_matmul_bias_lrelu(adj, support, b)  # leaky_relu(adj @ support + b)
    return h


# ---------------------------------------------------------------------------
# parameter init matching the PyTorch module
# ---------------------------------------------------------------------------
def init_gcn_e_g2g_params(key, in_dim, hgcn_dim, dtype=jnp.float32):
    k0, k1, k2, k3 = jax.random.split(key, 4)

    # gc0: truncated_normal_(mean=1.0, std=0.1) on a (in_dim, in_dim) weight.
    w0 = 1.0 + 0.1 * jax.random.truncated_normal(k0, -2.0, 2.0,
                                                 (in_dim, in_dim), dtype)
    b0 = jnp.zeros((in_dim,), dtype)

    def kaiming(k, fin, fout):
        # PyTorch kaiming_normal_ on a (fin, fout) tensor: fan_in = size(1) = fout.
        std = math.sqrt(2.0 / fout)
        return std * jax.random.normal(k, (fin, fout), dtype)

    w1 = kaiming(k1, in_dim, hgcn_dim[0]); b1 = jnp.zeros((hgcn_dim[0],), dtype)
    w2 = kaiming(k2, hgcn_dim[0], hgcn_dim[1]); b2 = jnp.zeros((hgcn_dim[1],), dtype)
    w3 = kaiming(k3, hgcn_dim[1], hgcn_dim[2]); b3 = jnp.zeros((hgcn_dim[2],), dtype)
    return ((w0, b0), (w1, b1), (w2, b2), (w3, b3))


# ---------------------------------------------------------------------------
# reference (pure JAX) for correctness check
# ---------------------------------------------------------------------------
def _ref_forward(x, adj, adj_g2g, params):
    (w0, b0), (w1, b1), (w2, b2), (w3, b3) = params
    h = _leaky_relu(x @ (adj_g2g * w0) + b0)
    h = _leaky_relu(adj @ (h @ w1) + b1)
    h = _leaky_relu(adj @ (h @ w2) + b2)
    h = _leaky_relu(adj @ (h @ w3) + b3)
    return h


if __name__ == "__main__":
    key = jax.random.PRNGKey(0)
    k_x, k_adj, k_g2g, k_p = jax.random.split(key, 4)

    num_nodes = 16
    in_dim = 32
    hgcn_dim = (32, 32, 16)

    x = jax.random.normal(k_x, (num_nodes, in_dim), dtype=jnp.float32)
    adj = jax.random.uniform(k_adj, (num_nodes, num_nodes), dtype=jnp.float32)
    adj = adj / jnp.sum(adj, axis=1, keepdims=True)        # row-normalized dense adjacency
    adj_g2g = jax.random.uniform(k_g2g, (in_dim, in_dim), dtype=jnp.float32)

    params = init_gcn_e_g2g_params(k_p, in_dim, hgcn_dim)

    y = gcn_e_g2g_forward(x, adj, adj_g2g, params)
    jax.block_until_ready(y)

    y_ref = _ref_forward(x, adj, adj_g2g, params)
    assert y.shape == (num_nodes, hgcn_dim[2])
    assert jnp.allclose(y, y_ref, atol=1e-4, rtol=1e-4), (
        float(jnp.max(jnp.abs(y - y_ref))))

    print("KERNEL_OK")
</pallas_src>

<mosaic_0001>
module attributes {stable_mosaic.version = 11 : i64} {
  func.func @_fused_gcn_kernel(%arg0: memref<16x128xf32, #tpu.memory_space<vmem>>, %arg1: memref<16x16xf32, #tpu.memory_space<vmem>>, %arg2: memref<128x128xf32, #tpu.memory_space<vmem>>, %arg3: memref<1x128xf32, #tpu.memory_space<vmem>>, %arg4: memref<128x128xf32, #tpu.memory_space<vmem>>, %arg5: memref<1x128xf32, #tpu.memory_space<vmem>>, %arg6: memref<128x128xf32, #tpu.memory_space<vmem>>, %arg7: memref<1x128xf32, #tpu.memory_space<vmem>>, %arg8: memref<128x128xf32, #tpu.memory_space<vmem>>, %arg9: memref<1x128xf32, #tpu.memory_space<vmem>>, %arg10: memref<16x128xf32, #tpu.memory_space<vmem>>) attributes {dimension_semantics = [], scalar_prefetch = 0 : i64, scratch_operands = 0 : i64, tpu.core_type = #tpu.core_type<tc>} {
    %c0 = arith.constant 0 : index
    %c0_0 = arith.constant 0 : index
    %0 = vector.load %arg0[%c0, %c0_0] : memref<16x128xf32, #tpu.memory_space<vmem>>, vector<16x128xf32>
    %c0_1 = arith.constant 0 : index
    %c0_2 = arith.constant 0 : index
    %1 = vector.load %arg2[%c0_1, %c0_2] : memref<128x128xf32, #tpu.memory_space<vmem>>, vector<128x128xf32>
    %cst = arith.constant dense<0.000000e+00> : vector<16x128xf32>
    %2 = tpu.matmul %0, %1, %cst {dimension_numbers = #tpu.dot_dimension_numbers<[1], [0], [0], [1], [0, 0, 1, 1], [], []>} : vector<16x128xf32>, vector<128x128xf32>, vector<16x128xf32> -> vector<16x128xf32>
    %c0_3 = arith.constant 0 : index
    %c0_4 = arith.constant 0 : index
    %3 = vector.load %arg3[%c0_3, %c0_4] : memref<1x128xf32, #tpu.memory_space<vmem>>, vector<1x128xf32>
    %4 = vector.broadcast %3 : vector<1x128xf32> to vector<16x128xf32>
    %5 = arith.addf %2, %4 : vector<16x128xf32>
    %cst_5 = arith.constant 0.000000e+00 : f32
    %6 = vector.broadcast %cst_5 : f32 to vector<16x128xf32>
    %7 = arith.cmpf ogt, %5, %6 : vector<16x128xf32>
    %cst_6 = arith.constant 2.500000e-01 : f32
    %8 = vector.broadcast %cst_6 : f32 to vector<16x128xf32>
    %9 = arith.mulf %8, %5 : vector<16x128xf32>
    %10 = arith.select %7, %5, %9 : vector<16x128xi1>, vector<16x128xf32>
    %c0_7 = arith.constant 0 : index
    %c0_8 = arith.constant 0 : index
    %11 = vector.load %arg1[%c0_7, %c0_8] : memref<16x16xf32, #tpu.memory_space<vmem>>, vector<16x16xf32>
    %c0_9 = arith.constant 0 : index
    %c0_10 = arith.constant 0 : index
    %12 = vector.load %arg4[%c0_9, %c0_10] : memref<128x128xf32, #tpu.memory_space<vmem>>, vector<128x128xf32>
    %cst_11 = arith.constant dense<0.000000e+00> : vector<16x128xf32>
    %13 = tpu.matmul %10, %12, %cst_11 {dimension_numbers = #tpu.dot_dimension_numbers<[1], [0], [0], [1], [0, 0, 1, 1], [], []>} : vector<16x128xf32>, vector<128x128xf32>, vector<16x128xf32> -> vector<16x128xf32>
    %cst_12 = arith.constant dense<0.000000e+00> : vector<16x128xf32>
    %14 = tpu.matmul %11, %13, %cst_12 {dimension_numbers = #tpu.dot_dimension_numbers<[1], [0], [0], [1], [0, 0, 1, 1], [], []>} : vector<16x16xf32>, vector<16x128xf32>, vector<16x128xf32> -> vector<16x128xf32>
    %c0_13 = arith.constant 0 : index
    %c0_14 = arith.constant 0 : index
    %15 = vector.load %arg5[%c0_13, %c0_14] : memref<1x128xf32, #tpu.memory_space<vmem>>, vector<1x128xf32>
    %16 = vector.broadcast %15 : vector<1x128xf32> to vector<16x128xf32>
    %17 = arith.addf %14, %16 : vector<16x128xf32>
    %cst_15 = arith.constant 0.000000e+00 : f32
    %18 = vector.broadcast %cst_15 : f32 to vector<16x128xf32>
    %19 = arith.cmpf ogt, %17, %18 : vector<16x128xf32>
    %cst_16 = arith.constant 2.500000e-01 : f32
    %20 = vector.broadcast %cst_16 : f32 to vector<16x128xf32>
    %21 = arith.mulf %20, %17 : vector<16x128xf32>
    %22 = arith.select %19, %17, %21 : vector<16x128xi1>, vector<16x128xf32>
    %c0_17 = arith.constant 0 : index
    %c0_18 = arith.constant 0 : index
    %23 = vector.load %arg6[%c0_17, %c0_18] : memref<128x128xf32, #tpu.memory_space<vmem>>, vector<128x128xf32>
    %cst_19 = arith.constant dense<0.000000e+00> : vector<16x128xf32>
    %24 = tpu.matmul %22, %23, %cst_19 {dimension_numbers = #tpu.dot_dimension_numbers<[1], [0], [0], [1], [0, 0, 1, 1], [], []>} : vector<16x128xf32>, vector<128x128xf32>, vector<16x128xf32> -> vector<16x128xf32>
    %cst_20 = arith.constant dense<0.000000e+00> : vector<16x128xf32>
    %25 = tpu.matmul %11, %24, %cst_20 {dimension_numbers = #tpu.dot_dimension_numbers<[1], [0], [0], [1], [0, 0, 1, 1], [], []>} : vector<16x16xf32>, vector<16x128xf32>, vector<16x128xf32> -> vector<16x128xf32>
    %c0_21 = arith.constant 0 : index
    %c0_22 = arith.constant 0 : index
    %26 = vector.load %arg7[%c0_21, %c0_22] : memref<1x128xf32, #tpu.memory_space<vmem>>, vector<1x128xf32>
    %27 = vector.broadcast %26 : vector<1x128xf32> to vector<16x128xf32>
    %28 = arith.addf %25, %27 : vector<16x128xf32>
    %cst_23 = arith.constant 0.000000e+00 : f32
    %29 = vector.broadcast %cst_23 : f32 to vector<16x128xf32>
    %30 = arith.cmpf ogt, %28, %29 : vector<16x128xf32>
    %cst_24 = arith.constant 2.500000e-01 : f32
    %31 = vector.broadcast %cst_24 : f32 to vector<16x128xf32>
    %32 = arith.mulf %31, %28 : vector<16x128xf32>
    %33 = arith.select %30, %28, %32 : vector<16x128xi1>, vector<16x128xf32>
    %c0_25 = arith.constant 0 : index
    %c0_26 = arith.constant 0 : index
    %34 = vector.load %arg8[%c0_25, %c0_26] : memref<128x128xf32, #tpu.memory_space<vmem>>, vector<128x128xf32>
    %cst_27 = arith.constant dense<0.000000e+00> : vector<16x128xf32>
    %35 = tpu.matmul %33, %34, %cst_27 {dimension_numbers = #tpu.dot_dimension_numbers<[1], [0], [0], [1], [0, 0, 1, 1], [], []>} : vector<16x128xf32>, vector<128x128xf32>, vector<16x128xf32> -> vector<16x128xf32>
    %cst_28 = arith.constant dense<0.000000e+00> : vector<16x128xf32>
    %36 = tpu.matmul %11, %35, %cst_28 {dimension_numbers = #tpu.dot_dimension_numbers<[1], [0], [0], [1], [0, 0, 1, 1], [], []>} : vector<16x16xf32>, vector<16x128xf32>, vector<16x128xf32> -> vector<16x128xf32>
    %c0_29 = arith.constant 0 : index
    %c0_30 = arith.constant 0 : index
    %37 = vector.load %arg9[%c0_29, %c0_30] : memref<1x128xf32, #tpu.memory_space<vmem>>, vector<1x128xf32>
    %38 = vector.broadcast %37 : vector<1x128xf32> to vector<16x128xf32>
    %39 = arith.addf %36, %38 : vector<16x128xf32>
    %cst_31 = arith.constant 0.000000e+00 : f32
    %40 = vector.broadcast %cst_31 : f32 to vector<16x128xf32>
    %41 = arith.cmpf ogt, %39, %40 : vector<16x128xf32>
    %cst_32 = arith.constant 2.500000e-01 : f32
    %42 = vector.broadcast %cst_32 : f32 to vector<16x128xf32>
    %43 = arith.mulf %42, %39 : vector<16x128xf32>
    %44 = arith.select %41, %39, %43 : vector<16x128xi1>, vector<16x128xf32>
    %c0_33 = arith.constant 0 : index
    %c0_34 = arith.constant 0 : index
    %45 = vector.load %arg10[%c0_33, %c0_34] : memref<16x128xf32, #tpu.memory_space<vmem>>, vector<16x128xf32>
    tpu.vector_store %arg10[%c0_33, %c0_34], %44 {strides = array<i32>} : memref<16x128xf32, #tpu.memory_space<vmem>>, vector<16x128xf32>,
    return
  }
}

</mosaic_0001>

<bundles_post_ra>
// kernel: tpu_custom_call.1
= control target key start
LH: loop header
LB: loop body
LE: loop exit
PB: predicated region body
PF: predicated region fallthrough
CT: control target
= control target key end

     0   :  { %15 = vsyncpa [#allocation3], 0  ;;  %s1578_s0 = inlined_call_operand.hbm [shape: f32[16,128], index: 0, kind: input, shape index: {}]   ;;  %s1579_s1 = inlined_call_operand.hbm [shape: f32[16,16], index: 1, kind: input, shape index: {}]   ;;  %s1580_s2 = inlined_call_operand.hbm [shape: f32[128,128], index: 2, kind: input, shape index: {}]   ;;  %s1581_s3 = inlined_call_operand.vmem [shape: f32[1,128], index: 3, kind: input, shape index: {}]   ;;  %s1582_s4 = inlined_call_operand.hbm [shape: f32[128,128], index: 4, kind: input, shape index: {}]   ;;  %s1583_s5 = inlined_call_operand.vmem [shape: f32[1,128], index: 5, kind: input, shape index: {}]   ;;  %s1584_s6 = inlined_call_operand.hbm [shape: f32[128,128], index: 6, kind: input, shape index: {}]   ;;  %s1585_s7 = inlined_call_operand.vmem [shape: f32[1,128], index: 7, kind: input, shape index: {}]   ;;  %s1586_s8 = inlined_call_operand.hbm [shape: f32[128,128], index: 8, kind: input, shape index: {}]   ;;  %s1587_s9 = inlined_call_operand.vmem [shape: f32[1,128], index: 9, kind: input, shape index: {}]   ;;  %s1588_s10 = inlined_call_operand.hbm [shape: f32[16,128], index: 10, kind: output, shape index: {}]  }
   0x1   :  { %16 = vsyncpa [#allocation6], 0 }
   0x2   :  { %17 = vsyncpa [#allocation9], 0 }
   0x3   :  { %18 = vsyncpa [#allocation12], 0 }
   0x4   :  { %19 = vsyncpa [#allocation4], 0  ;;  %s1360_s13 = smov [#allocation5]   ;;  %s1361_s15 = smov [#allocation8]  }
   0x5   :  { %s37_s14 = sshll.u32 %s1360_s13, 4  ;;  %s63_s16 = sshll.u32 %s1361_s15, 4  ;;  %s38_s14 = int_to_ptr.vmem [resolvable:$true] %s37_s14  ;;  %s1424_s16 = int_to_ptr.vmem [resolvable:$true] %s63_s16 }
   0x6   :  { %s1196_s19 = scalar_lea.hbm %s1579_s1, 256 }
   0x7   :  { %p1197_p0 = scmp.ne.s32.totalorder %s1579_s1, %s1196_s19  ;;  %p1200_p1 = scmp.lt.u32.totalorder %s1196_s19, %s1579_s1 }
   0x9   :  { %p1202_p2 = pnand %p1200_p1, %p1197_p0 }
   0xb   :  { %1205 = shalt.err (!%p1202_p2)
}
   0xc   :  { %s1206_s24 = scalar_lea.vmem %s38_s14, 256  ;;  %p1211_p4 = scmp.lt.s32.totalorder %s38_s14, %s38_s14 }
   0xd   :  { %p1207_p3 = scmp.ne.s32.totalorder %s38_s14, %s1206_s24  ;;  %p1212_p5 = scmp.lt.s32.totalorder %s1206_s24, %s1206_s24 }
   0xf   :  { %p1213_p6 = por %p1212_p5, %p1211_p4 }
  0x11   :  { %p1214_p7 = pnand %p1213_p6, %p1207_p3 }
  0x13   :  { %1217 = shalt.err (!%p1214_p7)
}
  0x14   :  { %s1362_s25 = smov 128   ;;  %s1363_s26 = smov 8  }
  0x15   :  { %43 = dma.hbm_to_vmem [thread:$0]  %s1579_s1, 256, %s38_s14, [#allocation6], %s1362_s25, %s1362_s25, %s1363_s26  }
  0x16   :  { %s1218_s11 = scalar_lea.hbm %s1582_s4, 2048 }
  0x17   :  { %p1219_p8 = scmp.ne.s32.totalorder %s1582_s4, %s1218_s11  ;;  %p1222_p9 = scmp.lt.u32.totalorder %s1218_s11, %s1582_s4 }
  0x19   :  { %p1224_p10 = pnand %p1222_p9, %p1219_p8 }
  0x1b   :  { %1227 = shalt.err (!%p1224_p10)
}
  0x1c   :  { %s1228_s18 = scalar_lea.vmem %s1424_s16, 2048  ;;  %p1233_p12 = scmp.lt.s32.totalorder %s1424_s16, %s1424_s16 }
  0x1d   :  { %p1229_p11 = scmp.ne.s32.totalorder %s1424_s16, %s1228_s18  ;;  %p1234_p13 = scmp.lt.s32.totalorder %s1228_s18, %s1228_s18 }
  0x1f   :  { %p1235_p0 = por %p1234_p13, %p1233_p12 }
  0x21   :  { %p1236_p1 = pnand %p1235_p0, %p1229_p11 }
  0x23   :  { %1239 = shalt.err (!%p1236_p1)
}
  0x24   :  { %69 = dma.hbm_to_vmem [thread:$0]  %s1582_s4, 2048, %s1424_s16, [#allocation9], %s1362_s25, %s1362_s25, %s1363_s26  }
  0x25   :  { %s1364_s19 = smov [#allocation2]   ;;  %s1365_s21 = smov [#allocation7]  }
  0x26   :  { %s25_s20 = sshll.u32 %s1364_s19, 4  ;;  %s49_s22 = sshll.u32 %s1365_s21, 4  ;;  %s26_s20 = int_to_ptr.vmem [resolvable:$true] %s25_s20  ;;  %s1461_s22 = int_to_ptr.vmem [resolvable:$true] %s49_s22 }
  0x27   :  { %s1240_s27 = scalar_lea.hbm %s1578_s0, 256 }
  0x28   :  { %p1241_p2 = scmp.ne.s32.totalorder %s1578_s0, %s1240_s27  ;;  %p1244_p3 = scmp.lt.u32.totalorder %s1240_s27, %s1578_s0 }
  0x2a   :  { %p1246_p4 = pnand %p1244_p3, %p1241_p2 }
  0x2c   :  { %1249 = shalt.err (!%p1246_p4)
}
  0x2d   :  { %s1250_s4 = scalar_lea.vmem %s26_s20, 256  ;;  %p1255_p6 = scmp.lt.s32.totalorder %s26_s20, %s26_s20 }
  0x2e   :  { %p1251_p5 = scmp.ne.s32.totalorder %s26_s20, %s1250_s4  ;;  %p1256_p7 = scmp.lt.s32.totalorder %s1250_s4, %s1250_s4 }
  0x30   :  { %p1257_p8 = por %p1256_p7, %p1255_p6 }
  0x32   :  { %p1258_p9 = pnand %p1257_p8, %p1251_p5 }
  0x34   :  { %1261 = shalt.err (!%p1258_p9)
}
  0x35   :  { %31 = dma.hbm_to_vmem [thread:$0]  %s1578_s0, 256, %s26_s20, [#allocation3], %s1362_s25, %s1362_s25, %s1363_s26  }
  0x36   :  { %s1262_s17 = scalar_lea.hbm %s1580_s2, 2048 }
  0x37   :  { %p1263_p10 = scmp.ne.s32.totalorder %s1580_s2, %s1262_s17  ;;  %p1266_p11 = scmp.lt.u32.totalorder %s1262_s17, %s1580_s2 }
  0x39   :  { %p1268_p12 = pnand %p1266_p11, %p1263_p10 }
  0x3b   :  { %1271 = shalt.err (!%p1268_p12)
}
  0x3c   :  { %s1272_s21 = scalar_lea.vmem %s1461_s22, 2048  ;;  %p1277_p0 = scmp.lt.s32.totalorder %s1461_s22, %s1461_s22 }
  0x3d   :  { %p1273_p13 = scmp.ne.s32.totalorder %s1461_s22, %s1272_s21  ;;  %p1278_p1 = scmp.lt.s32.totalorder %s1272_s21, %s1272_s21 }
  0x3f   :  { %p1279_p2 = por %p1278_p1, %p1277_p0 }
  0x41   :  { %p1280_p3 = pnand %p1279_p2, %p1273_p13 }
  0x43   :  { %1283 = shalt.err (!%p1280_p3)
}
  0x44   :  { %55 = dma.hbm_to_vmem [thread:$0]  %s1580_s2, 2048, %s1461_s22, [#allocation6], %s1362_s25, %s1362_s25, %s1363_s26  }
  0x45   :  { %s1366_s23 = smov [#allocation10]   ;;  %s1367_s27 = smov [#allocation11]  }
  0x46   :  { %s77_s24 = sshll.u32 %s1366_s23, 4  ;;  %s91_s28 = sshll.u32 %s1367_s27, 4  ;;  %s78_s24 = int_to_ptr.vmem [resolvable:$true] %s77_s24  ;;  %s1498_s28 = int_to_ptr.vmem [resolvable:$true] %s91_s28 }
  0x47   :  { %s1284_s11 = scalar_lea.hbm %s1584_s6, 2048 }
  0x48   :  { %p1285_p4 = scmp.ne.s32.totalorder %s1584_s6, %s1284_s11  ;;  %p1288_p5 = scmp.lt.u32.totalorder %s1284_s11, %s1584_s6 }
  0x4a   :  { %p1290_p6 = pnand %p1288_p5, %p1285_p4 }
  0x4c   :  { %1293 = shalt.err (!%p1290_p6)
}
  0x4d   :  { %s1294_s2 = scalar_lea.vmem %s78_s24, 2048  ;;  %p1299_p8 = scmp.lt.s32.totalorder %s78_s24, %s78_s24 }
  0x4e   :  { %p1295_p7 = scmp.ne.s32.totalorder %s78_s24, %s1294_s2  ;;  %p1300_p9 = scmp.lt.s32.totalorder %s1294_s2, %s1294_s2 }
  0x50   :  { %p1301_p10 = por %p1300_p9, %p1299_p8 }
  0x52   :  { %p1302_p11 = pnand %p1301_p10, %p1295_p7 }
  0x54   :  { %1305 = shalt.err (!%p1302_p11)
}
  0x55   :  { %83 = dma.hbm_to_vmem [thread:$0]  %s1584_s6, 2048, %s78_s24, [#allocation9], %s1362_s25, %s1362_s25, %s1363_s26  }
  0x56   :  { %s1306_s1 = scalar_lea.hbm %s1586_s8, 2048 }
  0x57   :  { %p1307_p12 = scmp.ne.s32.totalorder %s1586_s8, %s1306_s1  ;;  %p1310_p13 = scmp.lt.u32.totalorder %s1306_s1, %s1586_s8 }
  0x59   :  { %p1312_p0 = pnand %p1310_p13, %p1307_p12 }
  0x5b   :  { %1315 = shalt.err (!%p1312_p0)
}
  0x5c   :  { %s1316_s20 = scalar_lea.vmem %s1498_s28, 2048  ;;  %p1321_p2 = scmp.lt.s32.totalorder %s1498_s28, %s1498_s28 }
  0x5d   :  { %p1317_p1 = scmp.ne.s32.totalorder %s1498_s28, %s1316_s20  ;;  %p1322_p3 = scmp.lt.s32.totalorder %s1316_s20, %s1316_s20 }
  0x5f   :  { %p1323_p4 = por %p1322_p3, %p1321_p2 }
  0x61   :  { %p1324_p5 = pnand %p1323_p4, %p1317_p1 }
  0x63   :  { %1327 = shalt.err (!%p1324_p5)
}
  0x64   :  { %97 = dma.hbm_to_vmem [thread:$0]  %s1586_s8, 2048, %s1498_s28, [#allocation12], %s1362_s25, %s1362_s25, %s1363_s26  }
  0x65   :  { %1350 = dma.done.wait [#allocation3], 256  }
  0x66   :  { %1351 = vsyncadd [#allocation3], 4294967040 }
  0x67   :  { %1352 = dma.done.wait [#allocation6], 2304  }
  0x68   :  { %1353 = vsyncadd [#allocation6], 4294964992 }
  0x69   :  { %1354 = dma.done.wait [#allocation9], 4096  }
  0x6a   :  { %1355 = vsyncadd [#allocation9], 4294963200 }
  0x6b   :  { %1356 = dma.done.wait [#allocation12], 2048  }
  0x6c   :  { %1357 = vsyncadd [#allocation12], 4294965248  ;;  %v120_v0 = vld [vmem:[#allocation7] sm:$0xff]  ;;  %v121_v1 = vld [vmem:[#allocation7 + $0x8] sm:$0xff]  ;;  %vm324_vm2 = vcmask 130048   ;;  %s1368_s30 = smov [#allocation13]  }
  0x6d   :  { %v122_v2 = vld [vmem:[#allocation7 + $0x10] sm:$0xff]  ;;  %v1047_v3 = vpack.c.bf16 %v121_v1, %v120_v0  ;;  %v123_v4 = vld [vmem:[#allocation7 + $0x18] sm:$0xff]  ;;  %v124_v6 = vld [vmem:[#allocation7 + $0x20] sm:$0xff]  ;;  %s777_s11 = sshll.u32 %s1368_s30, 4  ;;  %s778_s11 = int_to_ptr.vmem [resolvable:$true] %s777_s11 }
  0x6e   :  { %v1051_v5 = vpack.c.bf16 %v123_v4, %v122_v2  ;;  %v125_v7 = vld [vmem:[#allocation7 + $0x28] sm:$0xff]  ;;  %v126_v9 = vld [vmem:[#allocation7 + $0x30] sm:$0xff]  ;;  %v127_v10 = vld [vmem:[#allocation7 + $0x38] sm:$0xff]  ;;  %s1328_s4 = scalar_lea.vmem %s778_s11, 256  ;;  %p1333_p7 = scmp.lt.s32.totalorder %s778_s11, %s778_s11 }
  0x6f   :  { %1048 = vmatprep.subr.bf16.mxu0 %v1047_v3  ;;  %v1055_v8 = vpack.c.bf16 %v125_v7, %v124_v6  ;;  %v118_v11 = vld [vmem:[#allocation2] sm:$0xff]  ;;  %v227_v13 = vld [vmem:[#allocation8 + $0x8] sm:$0xff]  ;;  %v228_v14 = vld [vmem:[#allocation8 + $0x10] sm:$0xff]  ;;  %v1059_v20 = vpack.c.bf16 %v127_v10, %v126_v9  ;;  %p1329_p6 = scmp.ne.s32.totalorder %s778_s11, %s1328_s4  ;;  %p1334_p8 = scmp.lt.s32.totalorder %s1328_s4, %s1328_s4 }
  0x70   :  { %1050 = vmatpush3.bf16.msra.mxu0 %v1047_v3  ;;  %918 = vmatprep.mubr.f32.mxu0 %v118_v11  ;;  %v226_v12 = vld [vmem:[#allocation8] sm:$0xff]  ;;  %v229_v16 = vld [vmem:[#allocation8 + $0x18] sm:$0xff]  ;;  %v231_v19 = vld [vmem:[#allocation8 + $0x28] sm:$0xff] }
  0x71   :  { %1052 = vmatprep.subr.bf16.mxu0 %v1051_v5  ;;  %v1079_v15 = vpack.c.bf16 %v227_v13, %v226_v12  ;;  %v1083_v17 = vpack.c.bf16 %v229_v16, %v228_v14  ;;  %v230_v18 = vld [vmem:[#allocation8 + $0x20] sm:$0xff]  ;;  %v129_v22 = vld [vmem:[#allocation7 + $0x48] sm:$0xff]  ;;  %v232_v24 = vld [vmem:[#allocation8 + $0x30] sm:$0xff]  ;;  %p1335_p9 = por %p1334_p8, %p1333_p7 }
  0x72   :  { %v128_v21 = vld [vmem:[#allocation7 + $0x40] sm:$0xff]  ;;  %v1087_v23 = vpack.c.bf16 %v231_v19, %v230_v18  ;;  %v233_v25 = vld [vmem:[#allocation8 + $0x38] sm:$0xff]  ;;  %v130_v27 = vld [vmem:[#allocation7 + $0x50] sm:$0xff] }
  0x73   :  { %1080 = vmatprep.subr.bf16.mxu1 %v1079_v15  ;;  %v1063_v26 = vpack.c.bf16 %v129_v22, %v128_v21  ;;  %v131_v28 = vld [vmem:[#allocation7 + $0x58] sm:$0xff]  ;;  %v1091_v29 = vpack.c.bf16 %v233_v25, %v232_v24  ;;  %v234_v30 = vld [vmem:[#allocation8 + $0x40] sm:$0xff]  ;;  %v235_v31 = vld [vmem:[#allocation8 + $0x48] sm:$0xff]  ;;  %p1336_p10 = pnand %p1335_p9, %p1329_p6 }
  0x74   :  { %1054 = vmatpush3.bf16.msra.mxu0 %v1051_v5  ;;  %1082 = vmatpush3.bf16.msra.mxu1 %v1079_v15  ;;  %v1067_v32 = vpack.c.bf16 %v131_v28, %v130_v27  ;;  %v132_v33 = vld [vmem:[#allocation7 + $0x60] sm:$0xff]  ;;  %v133_v34 = vld [vmem:[#allocation7 + $0x68] sm:$0xff]  ;;  %v1095_v35 = vpack.c.bf16 %v235_v31, %v234_v30  ;;  %v236_v36 = vld [vmem:[#allocation8 + $0x50] sm:$0xff] }
  0x75   :  { %1056 = vmatprep.subr.bf16.mxu0 %v1055_v8  ;;  %1084 = vmatprep.subr.bf16.mxu1 %v1083_v17  ;;  %v237_v37 = vld [vmem:[#allocation8 + $0x58] sm:$0xff]  ;;  %v1071_v38 = vpack.c.bf16 %v133_v34, %v132_v33  ;;  %v134_v39 = vld [vmem:[#allocation7 + $0x70] sm:$0xff]  ;;  %v119_v43 = vld [vmem:[#allocation2 + $0x8] sm:$0xff] }
  0x76   :  { %v135_v40 = vld [vmem:[#allocation7 + $0x78] sm:$0xff]  ;;  %v1099_v41 = vpack.c.bf16 %v237_v37, %v236_v36  ;;  %v238_v44 = vld [vmem:[#allocation8 + $0x60] sm:$0xff]  ;;  %v239_v45 = vld [vmem:[#allocation8 + $0x68] sm:$0xff] }
  0x77   :  { %v1075_v42 = vpack.c.bf16 %v135_v40, %v134_v39  ;;  %v1103_v46 = vpack.c.bf16 %v239_v45, %v238_v44  ;;  %v240_v47 = vld [vmem:[#allocation8 + $0x70] sm:$0xff]  ;;  %v241_v48 = vld [vmem:[#allocation8 + $0x78] sm:$0xff]  ;;  %v792_v50 = vld [vmem:[%s1581_s3] ss:$0 sm:$0xff] }
  0x78   :  { %1058 = vmatpush3.bf16.msra.mxu0 %v1055_v8  ;;  %1086 = vmatpush3.bf16.msra.mxu1 %v1083_v17  ;;  %v1107_v49 = vpack.c.bf16 %v241_v48, %v240_v47  ;;  %v1538_v59 = vld [vmem:[#allocation5] sm:$0xff]  ;;  %v412_v60 = vld [vmem:[#allocation10] sm:$0xff]  ;;  %v413_v61 = vld [vmem:[#allocation10 + $0x8] sm:$0xff] }
  0x79   :  { %1060 = vmatprep.subr.bf16.mxu0 %v1059_v20  ;;  %1088 = vmatprep.subr.bf16.mxu1 %v1087_v23  ;;  %v414_v62 = vld [vmem:[#allocation10 + $0x10] sm:$0xff]  ;;  %v1115_v63 = vpack.c.bf16 %v413_v61, %v412_v60  ;;  %v415_v0 = vld [vmem:[#allocation10 + $0x18] sm:$0xff]  ;;  %v416_v2 = vld [vmem:[#allocation10 + $0x20] sm:$0xff] }
  0x7a   :  { %v1119_v1 = vpack.c.bf16 %v415_v0, %v414_v62  ;;  %v417_v3 = vld [vmem:[#allocation10 + $0x28] sm:$0xff]  ;;  %v418_v5 = vld [vmem:[#allocation10 + $0x30] sm:$0xff]  ;;  %v419_v6 = vld [vmem:[#allocation10 + $0x38] sm:$0xff] }
  0x7b   :  { %v1123_v4 = vpack.c.bf16 %v417_v3, %v416_v2  ;;  %v1127_v7 = vpack.c.bf16 %v419_v6, %v418_v5  ;;  %v420_v8 = vld [vmem:[#allocation10 + $0x40] sm:$0xff]  ;;  %v421_v9 = vld [vmem:[#allocation10 + $0x48] sm:$0xff]  ;;  %v422_v11 = vld [vmem:[#allocation10 + $0x50] sm:$0xff] }
  0x7c   :  { %1062 = vmatpush3.bf16.msra.mxu0 %v1059_v20  ;;  %1090 = vmatpush3.bf16.msra.mxu1 %v1087_v23  ;;  %v1131_v10 = vpack.c.bf16 %v421_v9, %v420_v8  ;;  %v423_v12 = vld [vmem:[#allocation10 + $0x58] sm:$0xff]  ;;  %v424_v18 = vld [vmem:[#allocation10 + $0x60] sm:$0xff]  ;;  %v425_v19 = vld [vmem:[#allocation10 + $0x68] sm:$0xff] }
  0x7d   :  { %1064 = vmatprep.subr.bf16.mxu0 %v1063_v26  ;;  %1092 = vmatprep.subr.bf16.mxu1 %v1091_v29  ;;  %v1135_v13 = vpack.c.bf16 %v423_v12, %v422_v11  ;;  %v1542_v17 = vld [vmem:[#allocation5 + $0x8] sm:$0xff]  ;;  %v1139_v20 = vpack.c.bf16 %v425_v19, %v424_v18  ;;  %v426_v21 = vld [vmem:[#allocation10 + $0x70] sm:$0xff]  ;;  %v793_v24 = vld [vmem:[%s1583_s5] ss:$0 sm:$0xff] }
  0x7e   :  { %v427_v22 = vld [vmem:[#allocation10 + $0x78] sm:$0xff]  ;;  %v591_v33 = vld [vmem:[#allocation11] sm:$0xff]  ;;  %v592_v34 = vld [vmem:[#allocation11 + $0x8] sm:$0xff] }
  0x7f   :  { %v1143_v23 = vpack.c.bf16 %v427_v22, %v426_v21  ;;  %v593_v39 = vld [vmem:[#allocation11 + $0x10] sm:$0xff]  ;;  %v594_v40 = vld [vmem:[#allocation11 + $0x18] sm:$0xff]  ;;  %v599_v48 = vld [vmem:[#allocation11 + $0x40] sm:$0xff] }
  0x80   :  { %1066 = vmatpush3.bf16.msra.mxu0 %v1063_v26  ;;  %1094 = vmatpush3.bf16.msra.mxu1 %v1091_v29  ;;  %v597_v45 = vld [vmem:[#allocation11 + $0x30] sm:$0xff]  ;;  %v796_v60 = vld [vmem:[%s1585_s7] ss:$0 sm:$0xff] }
  0x81   :  { %1068 = vmatprep.subr.bf16.mxu0 %v1067_v32  ;;  %1096 = vmatprep.subr.bf16.mxu1 %v1095_v35  ;;  %v799_v8 = vld [vmem:[%s1587_s9] ss:$0 sm:$0xff] }
  0x84   :  { %1070 = vmatpush3.bf16.msra.mxu0 %v1067_v32  ;;  %1098 = vmatpush3.bf16.msra.mxu1 %v1095_v35 }
  0x85   :  { %1072 = vmatprep.subr.bf16.mxu0 %v1071_v38  ;;  %1100 = vmatprep.subr.bf16.mxu1 %v1099_v41 }
  0x88   :  { %1074 = vmatpush3.bf16.msra.mxu0 %v1071_v38  ;;  %1102 = vmatpush3.bf16.msra.mxu1 %v1099_v41  ;;  %v1151_v38 = vpack.c.bf16 %v592_v34, %v591_v33  ;;  %v1155_v41 = vpack.c.bf16 %v594_v40, %v593_v39 }
  0x89   :  { %1076 = vmatprep.subr.bf16.mxu0 %v1075_v42  ;;  %1104 = vmatprep.subr.bf16.mxu1 %v1103_v46 }
  0x8c   :  { %1078 = vmatpush3.bf16.msra.mxu0 %v1075_v42  ;;  %1106 = vmatpush3.bf16.msra.mxu1 %v1103_v46  ;;  %v595_v42 = vld [vmem:[#allocation11 + $0x20] sm:$0xff]  ;;  %v598_v46 = vld [vmem:[#allocation11 + $0x38] sm:$0xff] }
  0x8d   :  { %1108 = vmatprep.subr.bf16.mxu1 %v1107_v49  ;;  %v1163_v47 = vpack.c.bf16 %v598_v46, %v597_v45 }
  0x8f   :  { %919 = vmatmul.mubr.f32.vlgmr.msra.gmra.mrb[0].mxu0 %v119_v43  ;;  %v596_v43 = vld [vmem:[#allocation11 + $0x28] sm:$0xff] }
  0x90   :  { %1110 = vmatpush3.bf16.msra.mxu1 %v1107_v49  ;;  %960 = vmatprep.mubr.msk.f32.mxu0 %vm324_vm2, %v1538_v59  ;;  %v1159_v44 = vpack.c.bf16 %v596_v43, %v595_v42  ;;  %v600_v49 = vld [vmem:[#allocation11 + $0x48] sm:$0xff] }
  0x91   :  { %1116 = vmatprep.subr.bf16.mxu1 %v1115_v63 }
 0x162   :  { %v920_v51 = vpop.f32.mrb[0].mxu0 }
 0x163   :  { %v215_v52 = vadd.f32 %v920_v51, %v792_v50  ;;  %v209_v53 = vpop.f32.mrb[1].mxu0  ;;  %v601_v51 = vld [vmem:[#allocation11 + $0x50] sm:$0xff] }
 0x164   :  { %v210_v54 = vadd.f32 %v792_v50, %v209_v53  ;;  %v1167_v50 = vpack.c.bf16 %v600_v49, %v599_v48 }
 0x165   :  { %v221_v55 = vmul.f32 0.25, %v215_v52  ;;  %vm219_vm1 = vcmp.gt.f32.partialorder %v215_v52, 0.0 }
 0x166   :  { %vm218_vm0 = vcmp.gt.f32.partialorder %v210_v54, 0.0  ;;  %v220_v56 = vmul.f32 0.25, %v210_v54 }
 0x167   :  { %v223_v58 = vsel %vm219_vm1, %v215_v52, %v221_v55  ;;  %v602_v52 = vld [vmem:[#allocation11 + $0x58] sm:$0xff]  ;;  %v604_v55 = vld [vmem:[#allocation11 + $0x68] sm:$0xff] }
 0x168   :  { %v222_v57 = vsel %vm218_vm0, %v210_v54, %v220_v56  ;;  %v1171_v53 = vpack.c.bf16 %v602_v52, %v601_v51  ;;  %v603_v54 = vld [vmem:[#allocation11 + $0x60] sm:$0xff] }
 0x169   :  { %953 = vmatprep.mubr.f32.mxu1 %v222_v57  ;;  %v1175_v56 = vpack.c.bf16 %v604_v55, %v603_v54  ;;  %v605_v57 = vld [vmem:[#allocation11 + $0x70] sm:$0xff] }
 0x16a   :  { %954 = vmatmul.mubr.f32.vlgmr.msra.gmra.mrb[0].mxu1 %v223_v58  ;;  %v606_v58 = vld [vmem:[#allocation11 + $0x78] sm:$0xff] }
 0x16b   :  { %1118 = vmatpush3.bf16.msra.mxu1 %v1115_v63 }
 0x16c   :  { %1120 = vmatprep.subr.bf16.mxu1 %v1119_v1 }
 0x16f   :  { %1122 = vmatpush3.bf16.msra.mxu1 %v1119_v1 }
 0x170   :  { %1124 = vmatprep.subr.bf16.mxu1 %v1123_v4 }
 0x173   :  { %1126 = vmatpush3.bf16.msra.mxu1 %v1123_v4 }
 0x174   :  { %1128 = vmatprep.subr.bf16.mxu1 %v1127_v7 }
 0x177   :  { %1130 = vmatpush3.bf16.msra.mxu1 %v1127_v7 }
 0x178   :  { %1132 = vmatprep.subr.bf16.mxu1 %v1131_v10 }
 0x17b   :  { %1134 = vmatpush3.bf16.msra.mxu1 %v1131_v10 }
 0x17c   :  { %1136 = vmatprep.subr.bf16.mxu1 %v1135_v13 }
 0x17f   :  { %1138 = vmatpush3.bf16.msra.mxu1 %v1135_v13 }
 0x180   :  { %1140 = vmatprep.subr.bf16.mxu1 %v1139_v20 }
 0x183   :  { %1142 = vmatpush3.bf16.msra.mxu1 %v1139_v20 }
 0x184   :  { %1144 = vmatprep.subr.bf16.mxu1 %v1143_v23 }
 0x187   :  { %1146 = vmatpush3.bf16.msra.mxu1 %v1143_v23 }
 0x23d   :  { %v955_v14 = vpop.f32.mrb[0].mxu1 }
 0x23e   :  { %v308_v15 = vpop.f32.mrb[1].mxu1 }
 0x23f   :  { %v1111_v16 = vpack.c.bf16 %v955_v14, %v308_v15 }
 0x241   :  { %1112 = vmatprep.subr.bf16.mxu0 %v1111_v16 }
 0x242   :  { %1114 = vmatpush3.bf16.msra.mxu0 %v1111_v16 }
 0x245   :  { %961 = vmatmul.mubr.msk.f32.vlgmr.msra.gmra.mrb[2].mxu0 %vm324_vm2, %v1542_v17 }
 0x246   :  { %1002 = vmatprep.mubr.msk.f32.mxu0 %vm324_vm2, %v1538_v59 }
 0x318   :  { %v962_v25 = vpop.f32.mrb[2].mxu0 }
 0x319   :  { %v403_v26 = vadd.f32 %v962_v25, %v793_v24  ;;  %v397_v27 = vpop.f32.mrb[3].mxu0 }
 0x31a   :  { %v398_v28 = vadd.f32 %v793_v24, %v397_v27 }
 0x31b   :  { %v409_v29 = vmul.f32 0.25, %v403_v26  ;;  %vm407_vm3 = vcmp.gt.f32.partialorder %v403_v26, 0.0 }
 0x31c   :  { %v408_v30 = vmul.f32 0.25, %v398_v28  ;;  %vm406_vm4 = vcmp.gt.f32.partialorder %v398_v28, 0.0 }
 0x31d   :  { %v411_v32 = vsel %vm407_vm3, %v403_v26, %v409_v29 }
 0x31e   :  { %v410_v31 = vsel %vm406_vm4, %v398_v28, %v408_v30 }
 0x31f   :  { %995 = vmatprep.mubr.f32.mxu1 %v410_v31 }
 0x320   :  { %996 = vmatmul.mubr.f32.vlgmr.msra.gmra.mrb[2].mxu1 %v411_v32 }
 0x321   :  { %1044 = vmatprep.mubr.msk.f32.mxu1 %vm324_vm2, %v1538_v59  ;;  %v1179_v59 = vpack.c.bf16 %v606_v58, %v605_v57 }
 0x3f3   :  { %v997_v35 = vpop.f32.mrb[2].mxu1 }
 0x3f4   :  { %v494_v36 = vpop.f32.mrb[3].mxu1 }
 0x3f5   :  { %v1147_v37 = vpack.c.bf16 %v997_v35, %v494_v36 }
 0x3f7   :  { %1148 = vmatprep.subr.bf16.mxu0 %v1147_v37 }
 0x3f8   :  { %1150 = vmatpush3.bf16.msra.mxu0 %v1147_v37 }
 0x3f9   :  { %1152 = vmatprep.subr.bf16.mxu0 %v1151_v38 }
 0x3fb   :  { %1003 = vmatmul.mubr.msk.f32.vlgmr.msra.gmra.mrb[4].mxu0 %vm324_vm2, %v1542_v17 }
 0x3fc   :  { %1154 = vmatpush3.bf16.msra.mxu0 %v1151_v38 }
 0x3fd   :  { %1156 = vmatprep.subr.bf16.mxu0 %v1155_v41 }
 0x400   :  { %1158 = vmatpush3.bf16.msra.mxu0 %v1155_v41 }
 0x401   :  { %1160 = vmatprep.subr.bf16.mxu0 %v1159_v44 }
 0x404   :  { %1162 = vmatpush3.bf16.msra.mxu0 %v1159_v44 }
 0x405   :  { %1164 = vmatprep.subr.bf16.mxu0 %v1163_v47 }
 0x408   :  { %1166 = vmatpush3.bf16.msra.mxu0 %v1163_v47 }
 0x409   :  { %1168 = vmatprep.subr.bf16.mxu0 %v1167_v50 }
 0x40c   :  { %1170 = vmatpush3.bf16.msra.mxu0 %v1167_v50 }
 0x40d   :  { %1172 = vmatprep.subr.bf16.mxu0 %v1171_v53 }
 0x410   :  { %1174 = vmatpush3.bf16.msra.mxu0 %v1171_v53 }
 0x411   :  { %1176 = vmatprep.subr.bf16.mxu0 %v1175_v56 }
 0x414   :  { %1178 = vmatpush3.bf16.msra.mxu0 %v1175_v56 }
 0x415   :  { %1180 = vmatprep.subr.bf16.mxu0 %v1179_v59 }
 0x418   :  { %1182 = vmatpush3.bf16.msra.mxu0 %v1179_v59 }
 0x4ce   :  { %v1004_v61 = vpop.f32.mrb[4].mxu0 }
 0x4cf   :  { %v582_v62 = vadd.f32 %v1004_v61, %v796_v60  ;;  %v576_v63 = vpop.f32.mrb[5].mxu0 }
 0x4d0   :  { %v577_v0 = vadd.f32 %v796_v60, %v576_v63 }
 0x4d1   :  { %v588_v1 = vmul.f32 0.25, %v582_v62  ;;  %vm586_vm5 = vcmp.gt.f32.partialorder %v582_v62, 0.0 }
 0x4d2   :  { %v587_v2 = vmul.f32 0.25, %v577_v0  ;;  %vm585_vm6 = vcmp.gt.f32.partialorder %v577_v0, 0.0 }
 0x4d3   :  { %v590_v4 = vsel %vm586_vm5, %v582_v62, %v588_v1 }
 0x4d4   :  { %v589_v3 = vsel %vm585_vm6, %v577_v0, %v587_v2 }
 0x4d5   :  { %1037 = vmatprep.mubr.f32.mxu0 %v589_v3 }
 0x4d6   :  { %1038 = vmatmul.mubr.f32.vlgmr.msra.gmra.mrb[6].mxu0 %v590_v4 }
 0x5a9   :  { %v1039_v5 = vpop.f32.mrb[6].mxu0 }
 0x5aa   :  { %v673_v6 = vpop.f32.mrb[7].mxu0 }
 0x5ab   :  { %v1183_v7 = vpack.c.bf16 %v1039_v5, %v673_v6 }
 0x5ad   :  { %1184 = vmatprep.subr.bf16.mxu1 %v1183_v7 }
 0x5ae   :  { %1186 = vmatpush3.bf16.msra.mxu1 %v1183_v7 }
 0x5b1   :  { %1045 = vmatmul.mubr.msk.f32.vlgmr.msra.gmra.mrb[4].mxu1 %vm324_vm2, %v1542_v17 }
 0x684   :  { %v1046_v9 = vpop.f32.mrb[4].mxu1 }
 0x685   :  { %v761_v10 = vadd.f32 %v1046_v9, %v799_v8  ;;  %v755_v11 = vpop.f32.mrb[5].mxu1 }
 0x686   :  { %v756_v12 = vadd.f32 %v799_v8, %v755_v11 }
 0x687   :  { %vm765_vm7 = vcmp.gt.f32.partialorder %v761_v10, 0.0  ;;  %v767_v13 = vmul.f32 0.25, %v761_v10 }
 0x688   :  { %vm764_vm8 = vcmp.gt.f32.partialorder %v756_v12, 0.0  ;;  %v766_v14 = vmul.f32 0.25, %v756_v12 }
 0x689   :  { %v769_v15 = vsel %vm765_vm7, %v761_v10, %v767_v13 }
 0x68a   :  { %v768_v16 = vsel %vm764_vm8, %v756_v12, %v766_v14  ;;  %771 = vst [vmem:[#allocation13 + $0x8] sm:$0xff] %v769_v15 }
 0x68b   :  { %770 = vst [vmem:[#allocation13] sm:$0xff] %v768_v16 }
 0x68c   :  { %1339 = shalt.err (!%p1336_p10)
}
 0x68d   :  { %s1340_s12 = scalar_lea.hbm %s1588_s10, 256 }
 0x68e   :  { %p1341_p11 = scmp.ne.s32.totalorder %s1588_s10, %s1340_s12  ;;  %p1344_p12 = scmp.lt.u32.totalorder %s1340_s12, %s1588_s10 }
 0x690   :  { %p1346_p13 = pnand %p1344_p12, %p1341_p11 }
 0x692   :  { %1349 = shalt.err (!%p1346_p13)
}
 0x693   :  { %783 = dma.vmem_to_hbm [thread:$0]  %s778_s11, 256, %s1588_s10, [#allocation4], %s1362_s25, %s1362_s25, %s1363_s26  }
 0x694   :  { %1358 = dma.done.wait [#allocation4], 256  }
 0x695   :  { %1359 = vsyncadd [#allocation4], 4294967040 }
 0x696   :  { %787 = vsyncpa [#allocation3], 1 }
 0x697   :  { %788 = vsyncpa [#allocation6], 1 }
 0x698   :  { %789 = vsyncpa [#allocation9], 1 }
 0x699   :  { %790 = vsyncpa [#allocation12], 1 }
 0x69a   :  { %791 = vsyncpa [#allocation4], 1 }

</bundles_post_ra>
